<compile_context>
chip_gen: v7x
topology: tpu7x:2x2x1
jax: 0.10.0
libtpu: 0.0.40
codegen_flags: <defaults>
</compile_context>

<pallas_src>
import math

import numpy as np
import jax
import jax.numpy as jnp
from jax.experimental import pallas as pl
from jax.experimental.pallas import tpu as pltpu


# Field order follows x_ts[..., f]:  0=month, 1=day, 2=weekday, 3=hour, 4=minute
_FIELD_SIZES = (13, 32, 7, 24, 60)
_NUM_FIELDS = len(_FIELD_SIZES)
_FIELD_OFFSETS = tuple(int(o) for o in np.concatenate(([0], np.cumsum(_FIELD_SIZES)[:-1])))
_TOTAL_VOCAB = int(sum(_FIELD_SIZES))                 # 136
_V_PAD = ((_TOTAL_VOCAB + 127) // 128) * 128          # 256 (lane-aligned contraction dim)
_NUM_LIMBS = 3                                        # bf16 limbs of the f32 table


def _fixed_embedding_table(c_in: int, d_model: int) -> jnp.ndarray:
    """Sinusoidal table identical to PyTorch FixedEmbedding weight, (c_in, d_model)."""
    position = jnp.arange(c_in, dtype=jnp.float32)[:, None]
    div_term = jnp.exp(
        jnp.arange(0, d_model, 2, dtype=jnp.float32) * (-math.log(10000.0) / d_model)
    )
    w = jnp.zeros((c_in, d_model), dtype=jnp.float32)
    w = w.at[:, 0::2].set(jnp.sin(position * div_term))
    w = w.at[:, 1::2].set(jnp.cos(position * div_term))
    return w


def build_temporal_tables(d_model: int):
    """Per-field f32 tables + combined padded bf16 limb table (NUM_LIMBS, V_PAD, D_pad)."""
    tables = [_fixed_embedding_table(sz, d_model) for sz in _FIELD_SIZES]

    d_pad = ((d_model + 127) // 128) * 128            # lane-align D in the wrapper
    combined = jnp.zeros((_V_PAD, d_pad), dtype=jnp.float32)
    combined = combined.at[:_TOTAL_VOCAB, :d_model].set(jnp.concatenate(tables, axis=0))

    # bf16 limb split: hi + mid + lo ≈ combined to ~2^-24 relative error.
    limbs = []
    residual = combined
    for _ in range(_NUM_LIMBS):
        limb = residual.astype(jnp.bfloat16)
        limbs.append(limb)
        residual = residual - limb.astype(jnp.float32)
    table_limbs = jnp.stack(limbs, axis=0)            # (NUM_LIMBS, V_PAD, D_pad) bf16
    return tables, table_limbs


def _temporal_pe_kernel(ts_ref, limbs_ref, o_ref):
    # ts_ref   : (TILE, 5) int32  — raw timestamps (offsets folded in as constants here)
    # limbs_ref: (L, V_PAD, D) bf16 — bf16 limbs of the concatenated table (resident)
    # o_ref    : (TILE, D) f32
    ts = ts_ref[...]                                          # (TILE, 5)
    tile = ts.shape[0]
    v_pad = limbs_ref.shape[1]
    d = limbs_ref.shape[2]

    col = jax.lax.broadcasted_iota(jnp.int32, (1, v_pad), 1)  # (1, V_PAD) lane iota

    # Multi-hot: exactly one match per field (field ranges are disjoint), so an
    # OR-accumulation over boolean matches + a single bf16 cast is equivalent
    # to summing five one-hots.  A single bf16 MXU matmul per limb then does
    # all five embedding lookups AND their sum at once.
    hot = None
    for f in range(_NUM_FIELDS):                              # static unroll (5 fields)
        eq = (ts[:, f:f + 1] + _FIELD_OFFSETS[f]) == col      # (TILE, V_PAD) bool
        hot = eq if hot is None else jnp.logical_or(hot, eq)
    mh = hot.astype(jnp.bfloat16)                             # (TILE, V_PAD) exact 0/1

    acc = jnp.zeros((tile, d), dtype=jnp.float32)
    for l in range(limbs_ref.shape[0]):                       # static unroll (3 limbs)
        acc = acc + jnp.dot(mh, limbs_ref[l], preferred_element_type=jnp.float32)
    o_ref[...] = acc.astype(o_ref.dtype)


def _round_up(x: int, m: int) -> int:
    return ((x + m - 1) // m) * m


def _pick_tile(total_tokens: int, d_pad: int) -> int:
    """Largest token tile <=1024 (multiple of 8) fitting a conservative VMEM budget."""
    budget = 12 << 20                                         # per-step working-set target
    table_bytes = 2 * _NUM_LIMBS * _V_PAD * d_pad * 2        # resident limbs (double-buffer worst case)
    tile = 1024
    while tile > 8:
        per_step = (
            2 * tile * d_pad * 4                              # output double buffer (f32)
            + 2 * tile * _NUM_FIELDS * 4                      # timestamp double buffer
            + tile * _V_PAD * 2                               # bf16 multi-hot
            + tile * _V_PAD * 4                               # compare/bool intermediates
        )
        if table_bytes + per_step <= budget:
            break
        tile //= 2
    # Tiny inputs: a single sublane-aligned block covering everything.
    tile = min(tile, max(8, _round_up(total_tokens, 8)))
    return tile


def temporal_positional_encoding_forward(x_ts, table_limbs, d_model):
    """x_ts: (B, S, 5) int timestamps -> (B, S, d_model) f32 sum of five temporal embeddings."""
    B, S, F = x_ts.shape
    assert F == _NUM_FIELDS
    L, V_pad, D_pad = table_limbs.shape

    total = B * S
    ts_flat = x_ts.astype(jnp.int32).reshape(total, F)        # flatten batch*seq

    tile = _pick_tile(total, D_pad)
    grid = (pl.cdiv(total, tile),)                            # ragged tail handled by Pallas

    # bytes dominated by the output writeback; flops reflect the 3 bf16 MXU passes.
    cost = pl.CostEstimate(
        flops=int(2 * total * V_pad * D_pad * L),
        transcendentals=0,
        bytes_accessed=int(total * F * 4 + L * V_pad * D_pad * 2 + total * D_pad * 4),
    )

    # Explicit VMEM limit: resident limb table + per-step buffers + headroom.
    vmem_est = (
        2 * L * V_pad * D_pad * 2
        + 2 * tile * D_pad * 4
        + 2 * tile * F * 4
        + tile * V_pad * 6
    )
    vmem_limit = int(max(32 << 20, vmem_est + (4 << 20)))

    out = pl.pallas_call(
        _temporal_pe_kernel,
        out_shape=jax.ShapeDtypeStruct((total, D_pad), jnp.float32),
        grid_spec=pltpu.PrefetchScalarGridSpec(
            num_scalar_prefetch=0,
            grid=grid,
            in_specs=[
                # timestamp tile tracks the token-tile axis; last dim = full 5 fields
                pl.BlockSpec((tile, F), lambda i: (i, 0)),
                # limb table: constant block index -> stays resident across the grid
                pl.BlockSpec((L, V_pad, D_pad), lambda i: (0, 0, 0)),
            ],
            out_specs=pl.BlockSpec((tile, D_pad), lambda i: (i, 0)),
        ),
        compiler_params=pltpu.CompilerParams(
            dimension_semantics=("parallel",),
            vmem_limit_bytes=vmem_limit,
        ),
        cost_estimate=cost,
    )(ts_flat, table_limbs)

    if D_pad != d_model:
        out = out[:, :d_model]
    return out.reshape(B, S, d_model)


def temporal_positional_encoding_reference(x_ts, tables):
    """Pure-JAX reference: sum of the five per-field embedding lookups."""
    out = jnp.zeros(x_ts.shape[:2] + (tables[0].shape[1],), dtype=jnp.float32)
    for f, tab in enumerate(tables):
        out = out + jnp.take(tab, x_ts[:, :, f], axis=0)
    return out


if __name__ == "__main__":
    key = jax.random.PRNGKey(0)
    B, S, D = 2, 16, 128      # small demo shapes; D lane-aligned (multiple of 128)

    keys = jax.random.split(key, _NUM_FIELDS)
    cols = [
        jax.random.randint(keys[f], (B, S, 1), 0, _FIELD_SIZES[f], dtype=jnp.int32)
        for f in range(_NUM_FIELDS)
    ]
    x_ts = jnp.concatenate(cols, axis=-1)                     # (B, S, 5) timestamps

    tables, table_limbs = build_temporal_tables(D)

    out = temporal_positional_encoding_forward(x_ts, table_limbs, D)
    out = jax.block_until_ready(out)

    ref = temporal_positional_encoding_reference(x_ts, tables)
    assert out.shape == (B, S, D)
    assert out.dtype == jnp.float32
    assert jnp.allclose(out, ref, atol=1e-5, rtol=1e-5), "mismatch vs reference"

    print("KERNEL_OK")
</pallas_src>

<mosaic_0001>
module attributes {stable_mosaic.version = 11 : i64} {
  func.func @_temporal_pe_kernel(%arg0: i32, %arg1: memref<32x5xi32, #tpu.memory_space<vmem>>, %arg2: memref<3x256x128xbf16, #tpu.memory_space<vmem>>, %arg3: memref<32x128xf32, #tpu.memory_space<vmem>>) attributes {dimension_semantics = [#tpu.dimension_semantics<parallel>], iteration_bounds = array<i64: 1>, scalar_prefetch = 0 : i64, scratch_operands = 0 : i64, tpu.core_type = #tpu.core_type<tc>, window_params = [{transform_indices = @transform_0, window_bounds = array<i64: 32, 5>}, {pipeline_mode = #tpu.pipeline_mode<synchronous>, transform_indices = @transform_1, window_bounds = array<i64: 3, 256, 128>}, {transform_indices = @transform_2, window_bounds = array<i64: 32, 128>}]} {
    %c0 = arith.constant 0 : index
    %c0_0 = arith.constant 0 : index
    %0 = vector.load %arg1[%c0, %c0_0] : memref<32x5xi32, #tpu.memory_space<vmem>>, vector<32x5xi32>
    %1 = tpu.iota {dimensions = array<i32: 1>} : vector<1x256xi32>
    %2 = vector.extract_strided_slice %0 {offsets = [0, 0], sizes = [32, 1], strides = [1, 1]} : vector<32x5xi32> to vector<32x1xi32>
    %c0_i32 = arith.constant 0 : i32
    %3 = vector.broadcast %c0_i32 : i32 to vector<32x1xi32>
    %4 = arith.addi %2, %3 : vector<32x1xi32>
    %5 = vector.broadcast %4 : vector<32x1xi32> to vector<32x256xi32>
    %6 = vector.broadcast %1 : vector<1x256xi32> to vector<32x256xi32>
    %7 = arith.cmpi eq, %5, %6 : vector<32x256xi32>
    %8 = vector.extract_strided_slice %0 {offsets = [0, 1], sizes = [32, 1], strides = [1, 1]} : vector<32x5xi32> to vector<32x1xi32>
    %c13_i32 = arith.constant 13 : i32
    %9 = vector.broadcast %c13_i32 : i32 to vector<32x1xi32>
    %10 = arith.addi %8, %9 : vector<32x1xi32>
    %11 = vector.broadcast %10 : vector<32x1xi32> to vector<32x256xi32>
    %12 = vector.broadcast %1 : vector<1x256xi32> to vector<32x256xi32>
    %13 = arith.cmpi eq, %11, %12 : vector<32x256xi32>
    %14 = arith.ori %7, %13 : vector<32x256xi1>
    %15 = vector.extract_strided_slice %0 {offsets = [0, 2], sizes = [32, 1], strides = [1, 1]} : vector<32x5xi32> to vector<32x1xi32>
    %c45_i32 = arith.constant 45 : i32
    %16 = vector.broadcast %c45_i32 : i32 to vector<32x1xi32>
    %17 = arith.addi %15, %16 : vector<32x1xi32>
    %18 = vector.broadcast %17 : vector<32x1xi32> to vector<32x256xi32>
    %19 = vector.broadcast %1 : vector<1x256xi32> to vector<32x256xi32>
    %20 = arith.cmpi eq, %18, %19 : vector<32x256xi32>
    %21 = arith.ori %14, %20 : vector<32x256xi1>
    %22 = vector.extract_strided_slice %0 {offsets = [0, 3], sizes = [32, 1], strides = [1, 1]} : vector<32x5xi32> to vector<32x1xi32>
    %c52_i32 = arith.constant 52 : i32
    %23 = vector.broadcast %c52_i32 : i32 to vector<32x1xi32>
    %24 = arith.addi %22, %23 : vector<32x1xi32>
    %25 = vector.broadcast %24 : vector<32x1xi32> to vector<32x256xi32>
    %26 = vector.broadcast %1 : vector<1x256xi32> to vector<32x256xi32>
    %27 = arith.cmpi eq, %25, %26 : vector<32x256xi32>
    %28 = arith.ori %21, %27 : vector<32x256xi1>
    %29 = vector.extract_strided_slice %0 {offsets = [0, 4], sizes = [32, 1], strides = [1, 1]} : vector<32x5xi32> to vector<32x1xi32>
    %c76_i32 = arith.constant 76 : i32
    %30 = vector.broadcast %c76_i32 : i32 to vector<32x1xi32>
    %31 = arith.addi %29, %30 : vector<32x1xi32>
    %32 = vector.broadcast %31 : vector<32x1xi32> to vector<32x256xi32>
    %33 = vector.broadcast %1 : vector<1x256xi32> to vector<32x256xi32>
    %34 = arith.cmpi eq, %32, %33 : vector<32x256xi32>
    %35 = arith.ori %28, %34 : vector<32x256xi1>
    %36 = arith.extui %35 : vector<32x256xi1> to vector<32x256xi32>
    %37 = arith.sitofp %36 : vector<32x256xi32> to vector<32x256xf32>
    %38 = arith.truncf %37 : vector<32x256xf32> to vector<32x256xbf16>
    %cst = arith.constant 0.000000e+00 : f32
    %39 = vector.broadcast %cst : f32 to vector<32x128xf32>
    %c0_1 = arith.constant 0 : index
    %c0_2 = arith.constant 0 : index
    %c0_3 = arith.constant 0 : index
    %40 = vector.load %arg2[%c0_1, %c0_2, %c0_3] : memref<3x256x128xbf16, #tpu.memory_space<vmem>>, vector<1x256x128xbf16>
    %41 = vector.shape_cast %40 : vector<1x256x128xbf16> to vector<256x128xbf16>
    %cst_4 = arith.constant dense<0.000000e+00> : vector<32x128xf32>
    %42 = tpu.matmul %38, %41, %cst_4 {dimension_numbers = #tpu.dot_dimension_numbers<[1], [0], [0], [1], [0, 0, 1, 1], [], []>} : vector<32x256xbf16>, vector<256x128xbf16>, vector<32x128xf32> -> vector<32x128xf32>
    %43 = arith.addf %39, %42 : vector<32x128xf32>
    %c1 = arith.constant 1 : index
    %c0_5 = arith.constant 0 : index
    %c0_6 = arith.constant 0 : index
    %44 = vector.load %arg2[%c1, %c0_5, %c0_6] : memref<3x256x128xbf16, #tpu.memory_space<vmem>>, vector<1x256x128xbf16>
    %45 = vector.shape_cast %44 : vector<1x256x128xbf16> to vector<256x128xbf16>
    %cst_7 = arith.constant dense<0.000000e+00> : vector<32x128xf32>
    %46 = tpu.matmul %38, %45, %cst_7 {dimension_numbers = #tpu.dot_dimension_numbers<[1], [0], [0], [1], [0, 0, 1, 1], [], []>} : vector<32x256xbf16>, vector<256x128xbf16>, vector<32x128xf32> -> vector<32x128xf32>
    %47 = arith.addf %43, %46 : vector<32x128xf32>
    %c2 = arith.constant 2 : index
    %c0_8 = arith.constant 0 : index
    %c0_9 = arith.constant 0 : index
    %48 = vector.load %arg2[%c2, %c0_8, %c0_9] : memref<3x256x128xbf16, #tpu.memory_space<vmem>>, vector<1x256x128xbf16>
    %49 = vector.shape_cast %48 : vector<1x256x128xbf16> to vector<256x128xbf16>
    %cst_10 = arith.constant dense<0.000000e+00> : vector<32x128xf32>
    %50 = tpu.matmul %38, %49, %cst_10 {dimension_numbers = #tpu.dot_dimension_numbers<[1], [0], [0], [1], [0, 0, 1, 1], [], []>} : vector<32x256xbf16>, vector<256x128xbf16>, vector<32x128xf32> -> vector<32x128xf32>
    %51 = arith.addf %47, %50 : vector<32x128xf32>
    %c0_11 = arith.constant 0 : index
    %c0_12 = arith.constant 0 : index
    %52 = vector.load %arg3[%c0_11, %c0_12] : memref<32x128xf32, #tpu.memory_space<vmem>>, vector<32x128xf32>
    tpu.vector_store %arg3[%c0_11, %c0_12], %51 {strides = array<i32>} : memref<32x128xf32, #tpu.memory_space<vmem>>, vector<32x128xf32>,
    return
  }
  func.func @transform_0(%arg0: i32) -> (i32, i32) {
    %c0_i32 = arith.constant 0 : i32
    %c0_i32_0 = arith.constant 0 : i32
    return %arg0, %c0_i32 : i32, i32
  }
  func.func @transform_1(%arg0: i32) -> (i32, i32, i32) {
    %c0_i32 = arith.constant 0 : i32
    %c0_i32_0 = arith.constant 0 : i32
    %c0_i32_1 = arith.constant 0 : i32
    %c0_i32_2 = arith.constant 0 : i32
    return %c0_i32, %c0_i32_0, %c0_i32_1 : i32, i32, i32
  }
  func.func @transform_2(%arg0: i32) -> (i32, i32) {
    %c0_i32 = arith.constant 0 : i32
    %c0_i32_0 = arith.constant 0 : i32
    return %arg0, %c0_i32 : i32, i32
  }
}

</mosaic_0001>

<bundles_post_ra>
// kernel: tpu_custom_call.1
= control target key start
LH: loop header
LB: loop body
LE: loop exit
PB: predicated region body
PF: predicated region fallthrough
CT: control target
= control target key end

     0   :  { %7 = vsyncpa [#allocation3], 0  ;;  %s1230_s0 = inlined_call_operand.vmem [shape: s32[32,5], index: 0, kind: input, shape index: {}]   ;;  %s1231_s1 = inlined_call_operand.hbm [shape: bf16[3,256,128], index: 1, kind: input, shape index: {}]   ;;  %s1232_s2 = inlined_call_operand.hbm [shape: f32[32,128], index: 2, kind: output, shape index: {}]  }
   0x1   :  { %8 = vsyncpa [#allocation4], 0  ;;  %s1039_s9 = smov [#allocation2]   ;;  %s991_s13 = scalar_lea.hbm %s1231_s1, 6144 }
   0x2   :  { %s16_s10 = sshll.u32 %s1039_s9, 4  ;;  %p992_p0 = scmp.ne.s32.totalorder %s1231_s1, %s991_s13  ;;  %s17_s10 = int_to_ptr.vmem [resolvable:$true] %s16_s10 }
   0x3   :  { %p995_p1 = scmp.lt.u32.totalorder %s991_s13, %s1231_s1 }
   0x5   :  { %p997_p2 = pnand %p995_p1, %p992_p0 }
   0x7   :  { %1000 = shalt.err (!%p997_p2)
}
   0x8   :  { %s1001_s18 = scalar_lea.vmem %s17_s10, 6144  ;;  %p1006_p4 = scmp.lt.s32.totalorder %s17_s10, %s17_s10 }
   0x9   :  { %p1002_p3 = scmp.ne.s32.totalorder %s17_s10, %s1001_s18  ;;  %p1007_p5 = scmp.lt.s32.totalorder %s1001_s18, %s1001_s18 }
   0xb   :  { %p1008_p6 = por %p1007_p5, %p1006_p4 }
   0xd   :  { %p1009_p7 = pnand %p1008_p6, %p1002_p3 }
   0xf   :  { %1012 = shalt.err (!%p1009_p7)
}
  0x10   :  { %s1040_s19 = smov 64   ;;  %s1041_s20 = smov 4  }
  0x11   :  { %22 = dma.hbm_to_vmem [thread:$0]  %s1231_s1, 6144, %s17_s10, [#allocation3], %s1040_s19, %s1040_s19, %s1041_s20  }
  0x12   :  { %1035 = dma.done.wait [#allocation3], 6144  }
  0x13   :  { %1036 = vsyncadd [#allocation3], 4294961152  ;;  %v1042_v0 = vmov 2   ;;  %v1043_v1 = vmov 1   ;;  %v27_v2 = vld [vmem:[%s1230_s0] sm:$0xff]  ;;  %v28_v3 = vld [vmem:[%s1230_s0 + $0x8] sm:$0xff]  ;;  %v31_v58 = vlaneseq }
  0x14   :  { %929 = vset.pattern.permute.xlu0 %v1042_v0  ;;  %928 = vset.pattern.permute.xlu1 %v1043_v1  ;;  %v86_v4 = vadd.s32 45, %v27_v2  ;;  %v54_v5 = vadd.s32 13, %v27_v2  ;;  %v943_v6 = vld [vmem:[#allocation2 + $0xc0] sm:$0xff]   ;;  %v55_v7 = vadd.s32 13, %v28_v3  ;;  %v119_v8 = vadd.s32 52, %v28_v3  ;;  %v947_v14 = vld [vmem:[#allocation2 + $0xc8] sm:$0xff]  }
  0x15   :  { %816 = vmatprep.subr.bf16.mxu0 %v943_v6  ;;  %v944_v9 = vld [vmem:[#allocation2 + $0x40] sm:$0xff]   ;;  %v1044_v11 = vmov 3   ;;  %v87_v13 = vadd.s32 45, %v28_v3  ;;  %v948_v15 = vld [vmem:[#allocation2 + $0x48] sm:$0xff]   ;;  %v1045_v18 = vmov 0   ;;  %v951_v19 = vld [vmem:[#allocation2 + $0xd0] sm:$0xff]  }
  0x16   :  { %91 = vperm.xlu0 %929, %v86_v4   ;;  %59 = vperm.xlu1 %928, %v54_v5   ;;  %v945_v10 = vld [vmem:[#allocation2 + $0x80] sm:$0xff]   ;;  %v949_v16 = vld [vmem:[#allocation2 + $0x88] sm:$0xff]   ;;  %v118_v20 = vadd.s32 52, %v27_v2  ;;  %v952_v21 = vld [vmem:[#allocation2 + $0x50] sm:$0xff]   ;;  %v150_v28 = vadd.s32 76, %v27_v2  ;;  %v1046_v32 = vmov 4  }
  0x17   :  { %v946_v12 = vld [vmem:[#allocation2] sm:$0xff]   ;;  %844 = vmatprep.subr.bf16.mxu1 %v944_v9  ;;  %817 = vmatpush3.bf16.msra.mxu0 %v945_v10  ;;  %v950_v17 = vld [vmem:[#allocation2 + $0x8] sm:$0xff]   ;;  %v953_v22 = vld [vmem:[#allocation2 + $0x90] sm:$0xff]   ;;  %v151_v33 = vadd.s32 76, %v28_v3  ;;  %v1117_v61 = vand.u32 127, %v31_v58  ;;  %v1235_v6 = vmov 0 }
  0x18   :  { %845 = vmatpush3.bf16.msra.mxu1 %v946_v12  ;;  %818 = vmatprep.subr.bf16.mxu0 %v947_v14  ;;  %v954_v23 = vld [vmem:[#allocation2 + $0x10] sm:$0xff]   ;;  %v955_v25 = vld [vmem:[#allocation2 + $0xd8] sm:$0xff]   ;;  %v959_v31 = vld [vmem:[#allocation2 + $0xe0] sm:$0xff]   ;;  %v1047_v9 = vmov 0.0  }
  0x19   :  { %846 = vmatprep.subr.bf16.mxu1 %v948_v15  ;;  %v1092_v24 = vld [vmem:[%s1230_s0 + $0x10] sm:$0xff]  ;;  %v1097_v26 = vld [vmem:[%s1230_s0 + $0x18] sm:$0xff]  ;;  %v960_v34 = vld [vmem:[#allocation2 + $0x60] sm:$0xff]   ;;  %s1048_s0 = smov [#allocation5]  }
  0x1a   :  { %932 = vset.pattern.permute.xlu0 %v1044_v11  ;;  %62 = vperm.xlu1 %928, %v55_v7   ;;  %v956_v27 = vld [vmem:[#allocation2 + $0x58] sm:$0xff]   ;;  %v57_v35 = vadd.s32 13, %v1097_v26  ;;  %v961_v36 = vld [vmem:[#allocation2 + $0xa0] sm:$0xff]   ;;  %v963_v38 = vld [vmem:[#allocation2 + $0xe8] sm:$0xff]   ;;  %v120_v41 = vadd.s32 52, %v1092_v24  ;;  %v56_v45 = vadd.s32 13, %v1092_v24 }
  0x1b   :  { %126 = vperm.xlu0 %932, %v119_v8   ;;  %819 = vmatpush3.bf16.msra.mxu0 %v949_v16  ;;  %v957_v29 = vld [vmem:[#allocation2 + $0x98] sm:$0xff]   ;;  %v962_v37 = vld [vmem:[#allocation2 + $0x20] sm:$0xff]   ;;  %v964_v39 = vld [vmem:[#allocation2 + $0x68] sm:$0xff]   ;;  %v153_v47 = vadd.s32 76, %v1097_v26  ;;  %v88_v51 = vadd.s32 45, %v1092_v24  ;;  %v89_v53 = vadd.s32 45, %v1097_v26 }
  0x1c   :  { %847 = vmatpush3.bf16.msra.mxu1 %v950_v17  ;;  %820 = vmatprep.subr.bf16.mxu0 %v951_v19  ;;  %v958_v30 = vld [vmem:[#allocation2 + $0x18] sm:$0xff]   ;;  %v965_v40 = vld [vmem:[#allocation2 + $0xa8] sm:$0xff]   ;;  %v967_v43 = vld [vmem:[#allocation2 + $0xf0] sm:$0xff]   ;;  %v121_v56 = vadd.s32 52, %v1097_v26  ;;  %v152_v57 = vadd.s32 76, %v1092_v24  ;;  %s748_s30 = sshll.u32 %s1048_s0, 4  ;;  %s749_s30 = int_to_ptr.vmem [resolvable:$true] %s748_s30 }
  0x1d   :  { %848 = vmatprep.subr.bf16.mxu1 %v952_v21  ;;  %v966_v42 = vld [vmem:[#allocation2 + $0x28] sm:$0xff]   ;;  %v968_v44 = vld [vmem:[#allocation2 + $0x70] sm:$0xff]   ;;  %v971_v49 = vld [vmem:[#allocation2 + $0xf8] sm:$0xff]   ;;  %s1013_s3 = scalar_lea.vmem %s749_s30, 512  ;;  %p1018_p9 = scmp.lt.s32.totalorder %s749_s30, %s749_s30 }
  0x1e   :  { %930 = vset.pattern.permute.xlu1 %v1042_v0  ;;  %v969_v46 = vld [vmem:[#allocation2 + $0xb0] sm:$0xff]   ;;  %v972_v50 = vld [vmem:[#allocation2 + $0x78] sm:$0xff]   ;;  %v975_v55 = vld [vmem:[#allocation2 + $0x140] sm:$0xff]   ;;  %p1014_p8 = scmp.ne.s32.totalorder %s749_s30, %s1013_s3  ;;  %p1019_p10 = scmp.lt.s32.totalorder %s1013_s3, %s1013_s3 }
  0x1f   :  { %933 = vset.pattern.permute.xlu0 %v1045_v18  ;;  %94 = vperm.xlu1 %930, %v87_v13   ;;  %v970_v48 = vld [vmem:[#allocation2 + $0x30] sm:$0xff]   ;;  %v973_v52 = vld [vmem:[#allocation2 + $0xb8] sm:$0xff]   ;;  %v976_v17 = vld [vmem:[#allocation2 + $0x100] sm:$0xff]  }
  0x20   :  { %35 = vperm.xlu0 %933, %v27_v2   ;;  %821 = vmatpush3.bf16.msra.mxu0 %v953_v22  ;;  %v974_v54 = vld [vmem:[#allocation2 + $0x38] sm:$0xff]   ;;  %v977_v19 = vld [vmem:[#allocation2 + $0x148] sm:$0xff]   ;;  %p1020_p11 = por %p1019_p10, %p1018_p9 }
  0x21   :  { %849 = vmatpush3.bf16.msra.mxu1 %v954_v23  ;;  %822 = vmatprep.subr.bf16.mxu0 %v955_v25  ;;  %v978_v21 = vld [vmem:[#allocation2 + $0x108] sm:$0xff]   ;;  %v979_v23 = vld [vmem:[#allocation2 + $0x150] sm:$0xff]  }
  0x22   :  { %850 = vmatprep.subr.bf16.mxu1 %v956_v27  ;;  %p1021_p12 = pnand %p1020_p11, %p1014_p8 }
  0x23   :  { %931 = vset.pattern.permute.xlu1 %v1044_v11 }
  0x24   :  { %38 = vperm.xlu0 %933, %v28_v3   ;;  %123 = vperm.xlu1 %931, %v118_v20  }
  0x25   :  { %823 = vmatpush3.bf16.msra.mxu0 %v957_v29  ;;  %851 = vmatpush3.bf16.msra.mxu1 %v958_v30  ;;  %v982_v30 = vld [vmem:[#allocation2 + $0x118] sm:$0xff]  }
  0x26   :  { %824 = vmatprep.subr.bf16.mxu0 %v959_v31  ;;  %852 = vmatprep.subr.bf16.mxu1 %v960_v34  ;;  %v984_v34 = vld [vmem:[#allocation2 + $0x120] sm:$0xff]  }
  0x28   :  { %934 = vset.pattern.permute.xlu1 %v1046_v32  ;;  %41 = vperm.xlu0 %933, %v1092_v24   ;;  %v980_v24 = vld [vmem:[#allocation2 + $0x110] sm:$0xff]  }
  0x29   :  { %155 = vperm.xlu1 %934, %v150_v28   ;;  %825 = vmatpush3.bf16.msra.mxu0 %v961_v36 }
  0x2a   :  { %853 = vmatpush3.bf16.msra.mxu1 %v962_v37  ;;  %826 = vmatprep.subr.bf16.mxu0 %v963_v38  ;;  %v985_v37 = vld [vmem:[#allocation2 + $0x168] sm:$0xff]  }
  0x2b   :  { %854 = vmatprep.subr.bf16.mxu1 %v964_v39  ;;  %v986_v39 = vld [vmem:[#allocation2 + $0x128] sm:$0xff]  }
  0x2c   :  { %937 = vset.pattern.permute.xlu0 %v1043_v1 }
  0x2d   :  { %158 = vperm.xlu1 %934, %v151_v33   ;;  %68 = vperm.xlu0 %937, %v57_v35  }
  0x2e   :  { %827 = vmatpush3.bf16.msra.mxu0 %v965_v40  ;;  %855 = vmatpush3.bf16.msra.mxu1 %v966_v42  ;;  %v987_v40 = vld [vmem:[#allocation2 + $0x170] sm:$0xff]  }
  0x2f   :  { %828 = vmatprep.subr.bf16.mxu0 %v967_v43  ;;  %856 = vmatprep.subr.bf16.mxu1 %v968_v44  ;;  %v988_v42 = vld [vmem:[#allocation2 + $0x130] sm:$0xff]   ;;  %v989_v43 = vld [vmem:[#allocation2 + $0x178] sm:$0xff]  }
  0x31   :  { %935 = vset.pattern.permute.xlu1 %v1045_v18  ;;  %939 = vset.pattern.permute.xlu0 %v1044_v11 }
  0x32   :  { %44 = vperm.xlu1 %935, %v1097_v26   ;;  %129 = vperm.xlu0 %939, %v120_v41   ;;  %v981_v26 = vld [vmem:[#allocation2 + $0x158] sm:$0xff]  }
  0x33   :  { %829 = vmatpush3.bf16.msra.mxu0 %v969_v46  ;;  %857 = vmatpush3.bf16.msra.mxu1 %v970_v48 }
  0x34   :  { %830 = vmatprep.subr.bf16.mxu0 %v971_v49  ;;  %858 = vmatprep.subr.bf16.mxu1 %v972_v50  ;;  %v990_v50 = vld [vmem:[#allocation2 + $0x138] sm:$0xff]  }
  0x36   :  { %936 = vset.pattern.permute.xlu1 %v1043_v1  ;;  %942 = vset.pattern.permute.xlu0 %v1046_v32 }
  0x37   :  { %65 = vperm.xlu1 %936, %v56_v45   ;;  %164 = vperm.xlu0 %942, %v153_v47  }
  0x38   :  { %831 = vmatpush3.bf16.msra.mxu0 %v973_v52  ;;  %859 = vmatpush3.bf16.msra.mxu1 %v974_v54 }
  0x39   :  { %872 = vmatprep.subr.bf16.mxu0 %v975_v55  ;;  %900 = vmatprep.subr.bf16.mxu1 %v975_v55 }
  0x3b   :  { %938 = vset.pattern.permute.xlu1 %v1042_v0  ;;  %v1120_v0 = vadd.s32 128, %v1117_v61 }
  0x3c   :  { %97 = vperm.xlu1 %938, %v88_v51  }
  0x40   :  { %100 = vperm.xlu1 %938, %v89_v53  }
  0x44   :  { %940 = vset.pattern.permute.xlu1 %v1044_v11 }
  0x45   :  { %132 = vperm.xlu1 %940, %v121_v56  }
  0x49   :  { %941 = vset.pattern.permute.xlu1 %v1046_v32  ;;  %v983_v32 = vld [vmem:[#allocation2 + $0x160] sm:$0xff]  }
  0x4a   :  { %161 = vperm.xlu1 %941, %v152_v57  }
  0x95   :  { %v60_v59 = vpop.permute.xlu1 %59  ;;  %v92_v60 = vpop.permute.xlu0 %91 }
  0x96   :  { %vm70_vm0 = vcmp.eq.s32.totalorder %v60_v59, %v1117_v61  ;;  %vm102_vm1 = vcmp.eq.s32.totalorder %v92_v60, %v1117_v61  ;;  %vm71_vm4 = vcmp.eq.s32.totalorder %v60_v59, %v1120_v0  ;;  %vm103_vm5 = vcmp.eq.s32.totalorder %v92_v60, %v1120_v0 }
  0x99   :  { %v63_v62 = vpop.permute.xlu1 %62 }
  0x9a   :  { %v127_v63 = vpop.permute.xlu0 %126  ;;  %vm72_vm9 = vcmp.eq.s32.totalorder %v63_v62, %v1117_v61  ;;  %vm73_vm13 = vcmp.eq.s32.totalorder %v63_v62, %v1120_v0 }
  0x9e   :  { %v95_v1 = vpop.permute.xlu1 %94 }
  0x9f   :  { %v36_v2 = vpop.permute.xlu0 %35  ;;  %vm104_vm15 = vcmp.eq.s32.totalorder %v95_v1, %v1117_v61 }
  0xa0   :  { %vm46_vm2 = vcmp.eq.s32.totalorder %v36_v2, %v1117_v61  ;;  %vm47_vm3 = vcmp.eq.s32.totalorder %v36_v2, %v1120_v0 }
  0xa1   :  { %vm78_vm6 = vmor %vm46_vm2, %vm70_vm0  ;;  %vm105_vm2 = vcmp.eq.s32.totalorder %v95_v1, %v1120_v0 }
  0xa2   :  { %vm79_vm7 = vmor %vm47_vm3, %vm71_vm4 }
  0xa3   :  { %v39_v3 = vpop.permute.xlu0 %38  ;;  %vm1128_vm8 = vmor %vm78_vm6, %vm102_vm1  ;;  %v124_v5 = vpop.permute.xlu1 %123 }
  0xa4   :  { %vm48_vm10 = vcmp.eq.s32.totalorder %v39_v3, %v1117_v61  ;;  %vm49_vm11 = vcmp.eq.s32.totalorder %v39_v3, %v1120_v0  ;;  %vm1135_vm12 = vmor %vm79_vm7, %vm103_vm5  ;;  %vm134_vm1 = vcmp.eq.s32.totalorder %v124_v5, %v1117_v61  ;;  %vm135_vm4 = vcmp.eq.s32.totalorder %v124_v5, %v1120_v0 }
  0xa5   :  { %v1236_v6 = vsel %vm1135_vm12, 4294967295, %v1235_v6  ;;  %vm80_vm14 = vmor %vm48_vm10, %vm72_vm9  ;;  %vm136_vm9 = vcmp.eq.s32.totalorder %v127_v63, %v1117_v61 }
  0xa6   :  { %vm81_vm0 = vmor %vm49_vm11, %vm73_vm13  ;;  %vm1237_vm10 = vnez %v1236_v6  ;;  %vm137_vm13 = vcmp.eq.s32.totalorder %v127_v63, %v1120_v0 }
  0xa7   :  { %vm112_vm3 = vmor %vm80_vm14, %vm104_vm15  ;;  %v42_v18 = vpop.permute.xlu0 %41 }
  0xa8   :  { %vm113_vm6 = vmor %vm81_vm0, %vm105_vm2  ;;  %v156_v7 = vpop.permute.xlu1 %155 }
  0xa9   :  { %vm142_vm5 = vmor %vm1128_vm8, %vm134_vm1  ;;  %vm166_vm7 = vcmp.eq.s32.totalorder %v156_v7, %v1117_v61  ;;  %vm167_vm12 = vcmp.eq.s32.totalorder %v156_v7, %v1120_v0 }
  0xaa   :  { %vm143_vm11 = vmor %vm1237_vm10, %vm135_vm4 }
  0xab   :  { %vm174_vm14 = vmor %vm142_vm5, %vm166_vm7 }
  0xac   :  { %vm175_vm15 = vmor %vm143_vm11, %vm167_vm12  ;;  %v159_v8 = vpop.permute.xlu1 %158  ;;  %v760_v10 = vsel %vm174_vm14, 1.0, %v1047_v9  ;;  %v69_v22 = vpop.permute.xlu0 %68 }
  0xad   :  { %vm144_vm0 = vmor %vm112_vm3, %vm136_vm9  ;;  %vm168_vm2 = vcmp.eq.s32.totalorder %v159_v8, %v1117_v61  ;;  %vm169_vm1 = vcmp.eq.s32.totalorder %v159_v8, %v1120_v0  ;;  %v761_v12 = vsel %vm175_vm15, 1.0, %v1047_v9  ;;  %vm76_vm12 = vcmp.eq.s32.totalorder %v69_v22, %v1117_v61 }
  0xae   :  { %vm145_vm8 = vmor %vm113_vm6, %vm137_vm13  ;;  %vm77_vm6 = vcmp.eq.s32.totalorder %v69_v22, %v1120_v0  ;;  %vm50_vm13 = vcmp.eq.s32.totalorder %v42_v18, %v1117_v61 }
  0xaf   :  { %vm176_vm4 = vmor %vm144_vm0, %vm168_vm2 }
  0xb0   :  { %vm177_vm10 = vmor %vm145_vm8, %vm169_vm1  ;;  %v762_v11 = vsel %vm176_vm4, 1.0, %v1047_v9  ;;  %vm51_vm1 = vcmp.eq.s32.totalorder %v42_v18, %v1120_v0 }
  0xb1   :  { %v763_v13 = vsel %vm177_vm10, 1.0, %v1047_v9  ;;  %v45_v14 = vpop.permute.xlu1 %44  ;;  %v1158_v15 = vpack.c.bf16 %v762_v11, %v760_v10  ;;  %v130_v28 = vpop.permute.xlu0 %129 }
  0xb2   :  { %v1160_v16 = vpack.c.bf16 %v763_v13, %v761_v12  ;;  %vm52_vm3 = vcmp.eq.s32.totalorder %v45_v14, %v1117_v61  ;;  %vm53_vm5 = vcmp.eq.s32.totalorder %v45_v14, %v1120_v0  ;;  %vm138_vm4 = vcmp.eq.s32.totalorder %v130_v28, %v1117_v61 }
  0xb3   :  { %vm1171_vm9 = vmor %vm52_vm3, %vm76_vm12 }
  0xb4   :  { %395 = vmatprep.mubr.bf16.mxu0 %v1160_v16  ;;  %540 = vmatprep.mubr.bf16.mxu1 %v1160_v16  ;;  %vm1177_vm14 = vmor %vm53_vm5, %vm77_vm6 }
  0xb5   :  { %396 = vmatmul.mubr.bf16.vlgmr.msra.gmra.mrb[0].mxu0 %v1158_v15  ;;  %541 = vmatmul.mubr.bf16.vlgmr.msra.gmra.mrb[0].mxu1 %v1158_v15 }
  0xb6   :  { %v66_v20 = vpop.permute.xlu1 %65  ;;  %873 = vmatpush3.bf16.msra.mxu0 %v976_v17  ;;  %908 = vmatpush3.bf16.msra.mxu1 %v976_v17  ;;  %v165_v35 = vpop.permute.xlu0 %164 }
  0xb7   :  { %874 = vmatprep.subr.bf16.mxu0 %v977_v19  ;;  %901 = vmatprep.subr.bf16.mxu1 %v977_v19  ;;  %vm74_vm7 = vcmp.eq.s32.totalorder %v66_v20, %v1117_v61  ;;  %vm75_vm15 = vcmp.eq.s32.totalorder %v66_v20, %v1120_v0 }
  0xb8   :  { %vm82_vm0 = vmor %vm50_vm13, %vm74_vm7 }
  0xb9   :  { %vm83_vm10 = vmor %vm51_vm1, %vm75_vm15  ;;  %vm172_vm1 = vcmp.eq.s32.totalorder %v165_v35, %v1117_v61 }
  0xba   :  { %875 = vmatpush3.bf16.msra.mxu0 %v978_v21  ;;  %909 = vmatpush3.bf16.msra.mxu1 %v978_v21 }
  0xbb   :  { %v98_v25 = vpop.permute.xlu1 %97  ;;  %876 = vmatprep.subr.bf16.mxu0 %v979_v23  ;;  %902 = vmatprep.subr.bf16.mxu1 %v979_v23 }
  0xbc   :  { %vm106_vm11 = vcmp.eq.s32.totalorder %v98_v25, %v1117_v61  ;;  %vm107_vm2 = vcmp.eq.s32.totalorder %v98_v25, %v1120_v0 }
  0xbd   :  { %vm114_vm8 = vmor %vm82_vm0, %vm106_vm11  ;;  %vm139_vm11 = vcmp.eq.s32.totalorder %v130_v28, %v1120_v0 }
  0xbe   :  { %877 = vmatpush3.bf16.msra.mxu0 %v980_v24  ;;  %910 = vmatpush3.bf16.msra.mxu1 %v980_v24  ;;  %vm1188_vm3 = vmor %vm83_vm10, %vm107_vm2 }
  0xbf   :  { %v101_v31 = vpop.permute.xlu1 %100  ;;  %878 = vmatprep.subr.bf16.mxu0 %v981_v26  ;;  %903 = vmatprep.subr.bf16.mxu1 %v981_v26  ;;  %vm1193_vm5 = vmor %vm114_vm8, %vm138_vm4  ;;  %vm173_vm4 = vcmp.eq.s32.totalorder %v165_v35, %v1120_v0 }
  0xc0   :  { %vm108_vm12 = vcmp.eq.s32.totalorder %v101_v31, %v1117_v61  ;;  %vm109_vm6 = vcmp.eq.s32.totalorder %v101_v31, %v1120_v0 }
  0xc1   :  { %vm116_vm7 = vmor %vm1171_vm9, %vm108_vm12 }
  0xc2   :  { %879 = vmatpush3.bf16.msra.mxu0 %v982_v30  ;;  %911 = vmatpush3.bf16.msra.mxu1 %v982_v30  ;;  %vm117_vm13 = vmor %vm1177_vm14, %vm109_vm6 }
  0xc3   :  { %880 = vmatprep.subr.bf16.mxu0 %v983_v32  ;;  %904 = vmatprep.subr.bf16.mxu1 %v983_v32  ;;  %vm147_vm9 = vmor %vm1188_vm3, %vm139_vm11 }
  0xc4   :  { %v133_v38 = vpop.permute.xlu1 %132 }
  0xc5   :  { %vm140_vm15 = vcmp.eq.s32.totalorder %v133_v38, %v1117_v61  ;;  %vm141_vm0 = vcmp.eq.s32.totalorder %v133_v38, %v1120_v0 }
  0xc6   :  { %vm148_vm2 = vmor %vm116_vm7, %vm140_vm15  ;;  %881 = vmatpush3.bf16.msra.mxu0 %v984_v34  ;;  %912 = vmatpush3.bf16.msra.mxu1 %v984_v34 }
  0xc7   :  { %vm149_vm8 = vmor %vm117_vm13, %vm141_vm0  ;;  %882 = vmatprep.subr.bf16.mxu0 %v985_v37  ;;  %905 = vmatprep.subr.bf16.mxu1 %v985_v37 }
  0xc8   :  { %vm180_vm14 = vmor %vm148_vm2, %vm172_vm1 }
  0xc9   :  { %v162_v41 = vpop.permute.xlu1 %161  ;;  %vm181_vm10 = vmor %vm149_vm8, %vm173_vm4  ;;  %v766_v44 = vsel %vm180_vm14, 1.0, %v1047_v9 }
  0xca   :  { %vm170_vm12 = vcmp.eq.s32.totalorder %v162_v41, %v1117_v61  ;;  %vm171_vm6 = vcmp.eq.s32.totalorder %v162_v41, %v1120_v0  ;;  %883 = vmatpush3.bf16.msra.mxu0 %v986_v39  ;;  %913 = vmatpush3.bf16.msra.mxu1 %v986_v39  ;;  %v767_v46 = vsel %vm181_vm10, 1.0, %v1047_v9 }
  0xcb   :  { %vm178_vm7 = vmor %vm1193_vm5, %vm170_vm12  ;;  %884 = vmatprep.subr.bf16.mxu0 %v987_v40  ;;  %906 = vmatprep.subr.bf16.mxu1 %v987_v40 }
  0xcc   :  { %vm179_vm13 = vmor %vm147_vm9, %vm171_vm6  ;;  %v764_v45 = vsel %vm178_vm7, 1.0, %v1047_v9 }
  0xcd   :  { %v765_v47 = vsel %vm179_vm13, 1.0, %v1047_v9  ;;  %v200_v48 = vpack.c.bf16 %v766_v44, %v764_v45 }
  0xce   :  { %v201_v49 = vpack.c.bf16 %v767_v46, %v765_v47  ;;  %885 = vmatpush3.bf16.msra.mxu0 %v988_v42  ;;  %914 = vmatpush3.bf16.msra.mxu1 %v988_v42 }
  0xcf   :  { %886 = vmatprep.subr.bf16.mxu0 %v989_v43  ;;  %907 = vmatprep.subr.bf16.mxu1 %v989_v43 }
  0xd0   :  { %403 = vmatprep.mubr.bf16.mxu0 %v201_v49  ;;  %548 = vmatprep.mubr.bf16.mxu1 %v201_v49 }
  0xd1   :  { %404 = vmatmul.mubr.bf16.gmra.mrb[4].mxu0 %v200_v48  ;;  %549 = vmatmul.mubr.bf16.gmra.mrb[4].mxu1 %v200_v48 }
  0xd2   :  { %718 = vmatprep.mubr.bf16.mxu0 %v1160_v16  ;;  %726 = vmatprep.mubr.bf16.mxu1 %v201_v49 }
  0xd3   :  { %887 = vmatpush3.bf16.msra.mxu0 %v990_v50  ;;  %915 = vmatpush3.bf16.msra.mxu1 %v990_v50 }
  0xd9   :  { %719 = vmatmul.mubr.bf16.vlgmr.msra.gmra.mrb[8].mxu0 %v1158_v15  ;;  %727 = vmatmul.mubr.bf16.vlgmr.msra.gmra.mrb[8].mxu1 %v200_v48 }
 0x188   :  { %v832_v51 = vpop.f32.mrb[0].mxu0  ;;  %v860_v52 = vpop.f32.mrb[0].mxu1 }
 0x189   :  { %v833_v53 = vpop.f32.mrb[1].mxu0  ;;  %v861_v54 = vpop.f32.mrb[1].mxu1 }
 0x18a   :  { %v834_v55 = vadd.f32 %v833_v53, %v832_v51  ;;  %v862_v56 = vadd.f32 %v861_v54, %v860_v52  ;;  %v835_v57 = vpop.f32.mrb[2].mxu0  ;;  %v863_v58 = vpop.f32.mrb[2].mxu1 }
 0x18b   :  { %v836_v59 = vpop.f32.mrb[3].mxu0  ;;  %v864_v60 = vpop.f32.mrb[3].mxu1 }
 0x18c   :  { %v543_v61 = vadd.f32 %v862_v56, %v834_v55  ;;  %v837_v62 = vadd.f32 %v836_v59, %v835_v57  ;;  %v865_v63 = vadd.f32 %v864_v60, %v863_v58 }
 0x18e   :  { %v546_v0 = vadd.f32 %v865_v63, %v837_v62 }
 0x1a4   :  { %v838_v1 = vpop.f32.mrb[4].mxu0  ;;  %v866_v2 = vpop.f32.mrb[4].mxu1 }
 0x1a5   :  { %v839_v3 = vpop.f32.mrb[5].mxu0  ;;  %v867_v4 = vpop.f32.mrb[5].mxu1 }
 0x1a6   :  { %v840_v5 = vadd.f32 %v839_v3, %v838_v1  ;;  %v868_v6 = vadd.f32 %v867_v4, %v866_v2  ;;  %v841_v7 = vpop.f32.mrb[6].mxu0  ;;  %v869_v8 = vpop.f32.mrb[6].mxu1 }
 0x1a7   :  { %v842_v9 = vpop.f32.mrb[7].mxu0  ;;  %v870_v10 = vpop.f32.mrb[7].mxu1 }
 0x1a8   :  { %v551_v11 = vadd.f32 %v868_v6, %v840_v5  ;;  %v843_v12 = vadd.f32 %v842_v9, %v841_v7  ;;  %v871_v13 = vadd.f32 %v870_v10, %v869_v8 }
 0x1aa   :  { %v554_v14 = vadd.f32 %v871_v13, %v843_v12 }
 0x1ac   :  { %v888_v15 = vpop.f32.mrb[8].mxu0  ;;  %v894_v16 = vpop.f32.mrb[8].mxu1 }
 0x1ad   :  { %v889_v17 = vpop.f32.mrb[9].mxu0  ;;  %v895_v18 = vpop.f32.mrb[9].mxu1 }
 0x1ae   :  { %v890_v19 = vadd.f32 %v889_v17, %v888_v15  ;;  %v896_v20 = vadd.f32 %v895_v18, %v894_v16  ;;  %v891_v21 = vpop.f32.mrb[10].mxu0  ;;  %v897_v22 = vpop.f32.mrb[10].mxu1 }
 0x1af   :  { %v892_v23 = vpop.f32.mrb[11].mxu0  ;;  %v898_v24 = vpop.f32.mrb[11].mxu1 }
 0x1b0   :  { %v735_v25 = vadd.f32 %v890_v19, %v543_v61  ;;  %v737_v26 = vadd.f32 %v896_v20, %v551_v11  ;;  %v893_v27 = vadd.f32 %v892_v23, %v891_v21  ;;  %v899_v28 = vadd.f32 %v898_v24, %v897_v22 }
 0x1b2   :  { %739 = vst [vmem:[#allocation5] sm:$0xff] %v735_v25  ;;  %741 = vst [vmem:[#allocation5 + $0x10] sm:$0xff] %v737_v26  ;;  %v736_v29 = vadd.f32 %v893_v27, %v546_v0  ;;  %v738_v30 = vadd.f32 %v899_v28, %v554_v14 }
 0x1b4   :  { %740 = vst [vmem:[#allocation5 + $0x8] sm:$0xff] %v736_v29  ;;  %742 = vst [vmem:[#allocation5 + $0x18] sm:$0xff] %v738_v30 }
 0x1b5   :  { %1024 = shalt.err (!%p1021_p12)
}
 0x1b6   :  { %s1025_s6 = scalar_lea.hbm %s1232_s2, 512 }
 0x1b7   :  { %p1026_p13 = scmp.ne.s32.totalorder %s1232_s2, %s1025_s6  ;;  %p1029_p0 = scmp.lt.u32.totalorder %s1025_s6, %s1232_s2 }
 0x1b9   :  { %p1031_p1 = pnand %p1029_p0, %p1026_p13 }
 0x1bb   :  { %1034 = shalt.err (!%p1031_p1)
}
 0x1bc   :  { %s1049_s11 = smov 128   ;;  %s1050_s12 = smov 8  }
 0x1bd   :  { %754 = dma.vmem_to_hbm [thread:$0]  %s749_s30, 512, %s1232_s2, [#allocation4], %s1049_s11, %s1049_s11, %s1050_s12  }
 0x1be   :  { %1037 = dma.done.wait [#allocation4], 512  }
 0x1bf   :  { %1038 = vsyncadd [#allocation4], 4294966784 }
 0x1c0   :  { %758 = vsyncpa [#allocation3], 1 }
 0x1c1   :  { %759 = vsyncpa [#allocation4], 1 }

</bundles_post_ra>
